<compile_context>
chip_gen: v7x
topology: tpu7x:2x2x1
jax: 0.10.0
libtpu: 0.0.40
codegen_flags: <defaults>
</compile_context>

<pallas_src>
import math

import jax
import jax.numpy as jnp
from jax.experimental import pallas as pl
from jax.experimental.pallas import tpu as pltpu


def _round_up(x, m):
    return ((x + m - 1) // m) * m


def dqn_forward_kernel(x_ref, w1_ref, b1_ref, w2_ref, b2_ref, o_ref):
    # ----- Layer 1: x @ W1 + b1 -----------------------------------------
    x = x_ref[...]                              # (TB, K) f32
    w1 = w1_ref[...]                            # (K, 128) f32
    k_dim = x.shape[1]

    if k_dim <= 16:
        # Tiny contraction: VPU broadcast-FMAs (a K-deep MXU matmul would be
        # almost entirely wasted cycles).
        acc = x[:, 0:1] * w1[0:1, :]
        for k in range(1, k_dim):
            acc = acc + x[:, k:k + 1] * w1[k:k + 1, :]
        h = acc + b1_ref[...]                   # (TB,128) + (1,128) broadcast
    else:
        h = jnp.dot(x, w1, preferred_element_type=jnp.float32) + b1_ref[...]

    # LeakyReLU (PyTorch default negative_slope = 0.01)
    h = jnp.where(h >= 0, h, 0.01 * h)

    # ----- Layer 2: h @ W2 + b2 (unpadded (128, numOutputs) weights) -----
    out = jnp.dot(h, w2_ref[...], preferred_element_type=jnp.float32)
    out = out + b2_ref[...]                     # (TB,No) + (1,No) broadcast
    o_ref[...] = out.astype(o_ref.dtype)


def dqn_forward(x, w1, b1, w2, b2, *, block_batch=8192):
    """x: (B, numInputs) f32; w1: (numInputs, 128); b1: (1, 128);
    w2: (128, numOutputs); b2: (1, numOutputs)  ->  (B, numOutputs) f32."""
    B, num_inputs = x.shape
    hidden, num_outputs = w2.shape

    SUB = 8  # f32 sublane multiple

    # Batch tile: big enough to amortize per-step overhead, capped so that the
    # grid has >= 2 steps for realistic batches (v7x has 2 TensorCores).
    TB = max(SUB, min(_round_up(block_batch, SUB),
                      _round_up(pl.cdiv(B, 2), SUB)))
    B_pad = _round_up(B, TB)

    # Pad batch only when needed (garbage rows are row-independent and the
    # corresponding output rows are sliced off below).
    xp = x if B_pad == B else jnp.pad(x, ((0, B_pad - B), (0, 0)))

    grid = (B_pad // TB,)

    flops = 2 * B_pad * (num_inputs * hidden + hidden * num_outputs)
    bytes_accessed = (
        B_pad * num_inputs * 4           # x in (f32)
        + B_pad * num_outputs * 4        # out (f32, unpadded)
        + (w1.size + b1.size + w2.size + b2.size) * 4
    )

    out = pl.pallas_call(
        dqn_forward_kernel,
        out_shape=jax.ShapeDtypeStruct((B_pad, num_outputs), jnp.float32),
        grid=grid,
        in_specs=[
            pl.BlockSpec((TB, num_inputs), lambda i: (i, 0)),        # x tile
            pl.BlockSpec((num_inputs, hidden), lambda i: (0, 0)),    # w1 resident
            pl.BlockSpec((1, hidden), lambda i: (0, 0)),             # b1 resident
            pl.BlockSpec((hidden, num_outputs), lambda i: (0, 0)),   # w2 resident
            pl.BlockSpec((1, num_outputs), lambda i: (0, 0)),        # b2 resident
        ],
        out_specs=pl.BlockSpec((TB, num_outputs), lambda i: (i, 0)),
        compiler_params=pltpu.CompilerParams(
            dimension_semantics=("parallel",),
        ),
        cost_estimate=pl.CostEstimate(
            flops=flops, transcendentals=0, bytes_accessed=bytes_accessed
        ),
    )(xp, w1, b1, w2, b2)

    return out if B_pad == B else out[:B, :]


def init_dqn_params(key, num_inputs, num_outputs, hidden=128):
    """Mirror the PyTorch module: weights xavier_uniform_, biases PyTorch
    Linear default uniform(-1/sqrt(fan_in), +1/sqrt(fan_in)). Weights are
    stored pre-transposed as (in, out)."""
    k1, k2, k3, k4 = jax.random.split(key, 4)

    def xavier(k, fan_in, fan_out):
        bound = math.sqrt(6.0 / (fan_in + fan_out))
        return jax.random.uniform(k, (fan_in, fan_out), jnp.float32, -bound, bound)

    w1 = xavier(k1, num_inputs, hidden)
    w2 = xavier(k2, hidden, num_outputs)

    b1_bound = 1.0 / math.sqrt(num_inputs)
    b2_bound = 1.0 / math.sqrt(hidden)
    b1 = jax.random.uniform(k3, (1, hidden), jnp.float32, -b1_bound, b1_bound)
    b2 = jax.random.uniform(k4, (1, num_outputs), jnp.float32, -b2_bound, b2_bound)
    return w1, b1, w2, b2


def dqn_forward_ref(x, w1, b1, w2, b2):
    # Pure-JAX f32 reference, identical math to the PyTorch forward.
    h = x @ w1 + b1
    h = jnp.where(h >= 0, h, 0.01 * h)
    return h @ w2 + b2


# TODO(synk): get_action (epsilon-greedy env interaction) and train_model
# (MSE loss + optimizer step) are host-side training logic, not part of the
# forward pass; only the DQN.forward computation is implemented as a kernel.

if __name__ == "__main__":
    key = jax.random.PRNGKey(0)
    num_inputs, num_outputs = 4, 2

    kx, kp, kx2 = jax.random.split(key, 3)
    w1, b1, w2, b2 = init_dqn_params(kp, num_inputs, num_outputs)

    # Small-batch case (single tile).
    batch = 8
    x = jax.random.normal(kx, (batch, num_inputs), jnp.float32)
    out = jax.block_until_ready(dqn_forward(x, w1, b1, w2, b2))
    ref = dqn_forward_ref(x, w1, b1, w2, b2)
    assert out.shape == (batch, num_outputs)
    assert jnp.allclose(out, ref, atol=1e-4, rtol=1e-4), "small-batch mismatch"

    # Multi-tile case: exercises the batch grid, weight residency and the
    # ragged-batch padding path.
    batch2 = 200
    x2 = jax.random.normal(kx2, (batch2, num_inputs), jnp.float32)
    out2 = jax.block_until_ready(
        dqn_forward(x2, w1, b1, w2, b2, block_batch=64)
    )
    ref2 = dqn_forward_ref(x2, w1, b1, w2, b2)
    assert out2.shape == (batch2, num_outputs)
    assert jnp.allclose(out2, ref2, atol=1e-4, rtol=1e-4), "multi-tile mismatch"

    print("KERNEL_OK")
</pallas_src>

<mosaic_0001>
module attributes {stable_mosaic.version = 11 : i64} {
  func.func @dqn_forward_kernel(%arg0: i32, %arg1: memref<8x4xf32, #tpu.memory_space<vmem>>, %arg2: memref<4x128xf32, #tpu.memory_space<vmem>>, %arg3: memref<1x128xf32, #tpu.memory_space<vmem>>, %arg4: memref<128x2xf32, #tpu.memory_space<vmem>>, %arg5: memref<1x2xf32, #tpu.memory_space<vmem>>, %arg6: memref<8x2xf32, #tpu.memory_space<vmem>>) attributes {dimension_semantics = [#tpu.dimension_semantics<parallel>], iteration_bounds = array<i64: 1>, scalar_prefetch = 0 : i64, scratch_operands = 0 : i64, tpu.core_type = #tpu.core_type<tc>, window_params = [{transform_indices = @transform_0, window_bounds = array<i64: 8, 4>}, {pipeline_mode = #tpu.pipeline_mode<synchronous>, transform_indices = @transform_1, window_bounds = array<i64: 4, 128>}, {pipeline_mode = #tpu.pipeline_mode<synchronous>, transform_indices = @transform_2, window_bounds = array<i64: 1, 128>}, {pipeline_mode = #tpu.pipeline_mode<synchronous>, transform_indices = @transform_3, window_bounds = array<i64: 128, 2>}, {pipeline_mode = #tpu.pipeline_mode<synchronous>, transform_indices = @transform_4, window_bounds = array<i64: 1, 2>}, {transform_indices = @transform_5, window_bounds = array<i64: 8, 2>}]} {
    %c0 = arith.constant 0 : index
    %c0_0 = arith.constant 0 : index
    %0 = vector.load %arg1[%c0, %c0_0] : memref<8x4xf32, #tpu.memory_space<vmem>>, vector<8x4xf32>
    %c0_1 = arith.constant 0 : index
    %c0_2 = arith.constant 0 : index
    %1 = vector.load %arg2[%c0_1, %c0_2] : memref<4x128xf32, #tpu.memory_space<vmem>>, vector<4x128xf32>
    %2 = vector.extract_strided_slice %0 {offsets = [0, 0], sizes = [8, 1], strides = [1, 1]} : vector<8x4xf32> to vector<8x1xf32>
    %3 = vector.extract_strided_slice %1 {offsets = [0, 0], sizes = [1, 128], strides = [1, 1]} : vector<4x128xf32> to vector<1x128xf32>
    %4 = vector.broadcast %2 : vector<8x1xf32> to vector<8x128xf32>
    %5 = vector.broadcast %3 : vector<1x128xf32> to vector<8x128xf32>
    %6 = arith.mulf %4, %5 : vector<8x128xf32>
    %7 = vector.extract_strided_slice %0 {offsets = [0, 1], sizes = [8, 1], strides = [1, 1]} : vector<8x4xf32> to vector<8x1xf32>
    %8 = vector.extract_strided_slice %1 {offsets = [1, 0], sizes = [1, 128], strides = [1, 1]} : vector<4x128xf32> to vector<1x128xf32>
    %9 = vector.broadcast %7 : vector<8x1xf32> to vector<8x128xf32>
    %10 = vector.broadcast %8 : vector<1x128xf32> to vector<8x128xf32>
    %11 = arith.mulf %9, %10 : vector<8x128xf32>
    %12 = arith.addf %6, %11 : vector<8x128xf32>
    %13 = vector.extract_strided_slice %0 {offsets = [0, 2], sizes = [8, 1], strides = [1, 1]} : vector<8x4xf32> to vector<8x1xf32>
    %14 = vector.extract_strided_slice %1 {offsets = [2, 0], sizes = [1, 128], strides = [1, 1]} : vector<4x128xf32> to vector<1x128xf32>
    %15 = vector.broadcast %13 : vector<8x1xf32> to vector<8x128xf32>
    %16 = vector.broadcast %14 : vector<1x128xf32> to vector<8x128xf32>
    %17 = arith.mulf %15, %16 : vector<8x128xf32>
    %18 = arith.addf %12, %17 : vector<8x128xf32>
    %19 = vector.extract_strided_slice %0 {offsets = [0, 3], sizes = [8, 1], strides = [1, 1]} : vector<8x4xf32> to vector<8x1xf32>
    %20 = vector.extract_strided_slice %1 {offsets = [3, 0], sizes = [1, 128], strides = [1, 1]} : vector<4x128xf32> to vector<1x128xf32>
    %21 = vector.broadcast %19 : vector<8x1xf32> to vector<8x128xf32>
    %22 = vector.broadcast %20 : vector<1x128xf32> to vector<8x128xf32>
    %23 = arith.mulf %21, %22 : vector<8x128xf32>
    %24 = arith.addf %18, %23 : vector<8x128xf32>
    %c0_3 = arith.constant 0 : index
    %c0_4 = arith.constant 0 : index
    %25 = vector.load %arg3[%c0_3, %c0_4] : memref<1x128xf32, #tpu.memory_space<vmem>>, vector<1x128xf32>
    %26 = vector.broadcast %25 : vector<1x128xf32> to vector<8x128xf32>
    %27 = arith.addf %24, %26 : vector<8x128xf32>
    %cst = arith.constant 0.000000e+00 : f32
    %28 = vector.broadcast %cst : f32 to vector<8x128xf32>
    %29 = arith.cmpf oge, %27, %28 : vector<8x128xf32>
    %cst_5 = arith.constant 0.00999999977 : f32
    %30 = vector.broadcast %cst_5 : f32 to vector<8x128xf32>
    %31 = arith.mulf %30, %27 : vector<8x128xf32>
    %32 = arith.select %29, %27, %31 : vector<8x128xi1>, vector<8x128xf32>
    %c0_6 = arith.constant 0 : index
    %c0_7 = arith.constant 0 : index
    %33 = vector.load %arg4[%c0_6, %c0_7] : memref<128x2xf32, #tpu.memory_space<vmem>>, vector<128x2xf32>
    %cst_8 = arith.constant dense<0.000000e+00> : vector<8x2xf32>
    %34 = tpu.matmul %32, %33, %cst_8 {dimension_numbers = #tpu.dot_dimension_numbers<[1], [0], [0], [1], [0, 0, 1, 1], [], []>} : vector<8x128xf32>, vector<128x2xf32>, vector<8x2xf32> -> vector<8x2xf32>
    %c0_9 = arith.constant 0 : index
    %c0_10 = arith.constant 0 : index
    %35 = vector.load %arg5[%c0_9, %c0_10] : memref<1x2xf32, #tpu.memory_space<vmem>>, vector<1x2xf32>
    %36 = vector.broadcast %35 : vector<1x2xf32> to vector<8x2xf32>
    %37 = arith.addf %34, %36 : vector<8x2xf32>
    %c0_11 = arith.constant 0 : index
    %c0_12 = arith.constant 0 : index
    %38 = vector.load %arg6[%c0_11, %c0_12] : memref<8x2xf32, #tpu.memory_space<vmem>>, vector<8x2xf32>
    tpu.vector_store %arg6[%c0_11, %c0_12], %37 {strides = array<i32>} : memref<8x2xf32, #tpu.memory_space<vmem>>, vector<8x2xf32>,
    return
  }
  func.func @transform_0(%arg0: i32) -> (i32, i32) {
    %c0_i32 = arith.constant 0 : i32
    %c0_i32_0 = arith.constant 0 : i32
    return %arg0, %c0_i32 : i32, i32
  }
  func.func @transform_1(%arg0: i32) -> (i32, i32) {
    %c0_i32 = arith.constant 0 : i32
    %c0_i32_0 = arith.constant 0 : i32
    %c0_i32_1 = arith.constant 0 : i32
    return %c0_i32, %c0_i32_0 : i32, i32
  }
  func.func @transform_2(%arg0: i32) -> (i32, i32) {
    %c0_i32 = arith.constant 0 : i32
    %c0_i32_0 = arith.constant 0 : i32
    %c0_i32_1 = arith.constant 0 : i32
    return %c0_i32, %c0_i32_0 : i32, i32
  }
  func.func @transform_3(%arg0: i32) -> (i32, i32) {
    %c0_i32 = arith.constant 0 : i32
    %c0_i32_0 = arith.constant 0 : i32
    %c0_i32_1 = arith.constant 0 : i32
    return %c0_i32, %c0_i32_0 : i32, i32
  }
  func.func @transform_4(%arg0: i32) -> (i32, i32) {
    %c0_i32 = arith.constant 0 : i32
    %c0_i32_0 = arith.constant 0 : i32
    %c0_i32_1 = arith.constant 0 : i32
    return %c0_i32, %c0_i32_0 : i32, i32
  }
  func.func @transform_5(%arg0: i32) -> (i32, i32) {
    %c0_i32 = arith.constant 0 : i32
    %c0_i32_0 = arith.constant 0 : i32
    return %arg0, %c0_i32 : i32, i32
  }
}

</mosaic_0001>

<bundles_post_ra>
// kernel: tpu_custom_call.1
= control target key start
LH: loop header
LB: loop body
LE: loop exit
PB: predicated region body
PF: predicated region fallthrough
CT: control target
= control target key end

     0   :  { %v262_v0 = vmov 0   ;;  %v263_v2 = vmov 2   ;;  %v264_v8 = vmov 0.0|0.0   ;;  %v265_v12 = vmov 1   ;;  %s362_s0 = inlined_call_operand.vmem [shape: f32[8,4], index: 0, kind: input, shape index: {}]   ;;  %s363_s3 = inlined_call_operand.vmem [shape: f32[128,2], index: 3, kind: input, shape index: {}]   ;;  %s364_s1 = inlined_call_operand.vmem [shape: f32[4,128], index: 1, kind: input, shape index: {}]   ;;  %s365_s2 = inlined_call_operand.vmem [shape: f32[1,128], index: 2, kind: input, shape index: {}]   ;;  %s366_s4 = inlined_call_operand.vmem [shape: f32[1,2], index: 4, kind: input, shape index: {}]   ;;  %s367_s5 = inlined_call_operand.vmem [shape: f32[8,2], index: 5, kind: output, shape index: {}]  }
   0x1   :  { %257 = vset.pattern.permute.xlu0 %v262_v0  ;;  %v20_v1 = vld [vmem:[%s362_s0] sm:$0xff]  ;;  %259 = vset.pattern.permute.xlu1 %v263_v2  ;;  %v74_v4 = vld [vmem:[%s363_s3 + $0x8] sm:$0xff]  ;;  %v75_v6 = vld [vmem:[%s363_s3 + $0x10] sm:$0xff]  ;;  %v266_v13 = vmov 3   ;;  %vm267_vm0 = vmmov 0   ;;  %v268_v21 = vmov 0.0   ;;  %v27_v31 = vlaneseq }
   0x2   :  { %v73_v3 = vld [vmem:[%s363_s3] sm:$0xff]  ;;  %24 = vperm.xlu0 %257, %v20_v1   ;;  %43 = vperm.xlu1 %259, %v20_v1   ;;  %v76_v7 = vld [vmem:[%s363_s3 + $0x18] sm:$0xff]  ;;  %v78_v11 = vld [vmem:[%s363_s3 + $0x28] sm:$0xff]  ;;  %vm166_vm2 = vcmask 15360  }
   0x3   :  { %v227_v5 = vpack.c.bf16 %v74_v4, %v73_v3  ;;  %226 = vmatprep.subr.bf16.mxu0 %v264_v8  ;;  %v230_v9 = vpack.c.bf16 %v76_v7, %v75_v6  ;;  %v77_v10 = vld [vmem:[%s363_s3 + $0x20] sm:$0xff]  ;;  %v79_v15 = vld [vmem:[%s363_s3 + $0x30] sm:$0xff]  ;;  %v80_v16 = vld [vmem:[%s363_s3 + $0x38] sm:$0xff]  ;;  %223 = vmatprep.mubr.msk.f32.mxu0 %vm267_vm0, %v268_v21  ;;  %v28_v32 = vshrl.u32 %v27_v31, 7 }
   0x4   :  { %v233_v14 = vpack.c.bf16 %v78_v11, %v77_v10  ;;  %v236_v17 = vpack.c.bf16 %v80_v16, %v79_v15  ;;  %v81_v18 = vld [vmem:[%s363_s3 + $0x40] sm:$0xff]  ;;  %v82_v19 = vld [vmem:[%s363_s3 + $0x48] sm:$0xff]  ;;  %v83_v22 = vld [vmem:[%s363_s3 + $0x50] sm:$0xff] }
   0x5   :  { %228 = vmatpush3.bf16.msra.mxu0 %v227_v5  ;;  %v239_v20 = vpack.c.bf16 %v82_v19, %v81_v18  ;;  %v84_v23 = vld [vmem:[%s363_s3 + $0x58] sm:$0xff]  ;;  %v85_v25 = vld [vmem:[%s363_s3 + $0x60] sm:$0xff]  ;;  %v86_v26 = vld [vmem:[%s363_s3 + $0x68] sm:$0xff]  ;;  %v29_v33 = vsub.s32 0, %v28_v32  ;;  %v38_v34 = vsub.s32 1, %v28_v32  ;;  %v48_v37 = vsub.s32 2, %v28_v32 }
   0x6   :  { %229 = vmatprep.subr.bf16.mxu0 %v264_v8  ;;  %258 = vset.pattern.permute.xlu0 %v265_v12  ;;  %v242_v24 = vpack.c.bf16 %v84_v23, %v83_v22  ;;  %v245_v27 = vpack.c.bf16 %v86_v26, %v85_v25  ;;  %v87_v28 = vld [vmem:[%s363_s3 + $0x70] sm:$0xff]  ;;  %v88_v29 = vld [vmem:[%s363_s3 + $0x78] sm:$0xff]  ;;  %v21_v35 = vld [vmem:[%s364_s1] sm:$0xf]  ;;  %v58_v39 = vsub.s32 3, %v28_v32 }
   0x7   :  { %260 = vset.pattern.permute.xlu1 %v266_v13  ;;  %33 = vperm.xlu0 %258, %v20_v1   ;;  %v248_v30 = vpack.c.bf16 %v88_v29, %v87_v28  ;;  %v30_v40 = vrot.slane %v21_v35, %v29_v33  ;;  %v39_v41 = vrot.slane %v21_v35, %v38_v34  ;;  %v172_v52 = vld [vmem:[%s365_s2] ss:$0 sm:$0xff] }
   0x8   :  { %53 = vperm.xlu1 %260, %v20_v1   ;;  %v49_v42 = vrot.slane %v21_v35, %v48_v37  ;;  %v59_v43 = vrot.slane %v21_v35, %v58_v39  ;;  %v173_v57 = vld [vmem:[%s366_s4] ss:$0 sm:$0xff] }
   0x9   :  { %231 = vmatpush3.bf16.msra.mxu0 %v230_v9 }
   0xa   :  { %232 = vmatprep.subr.bf16.mxu0 %v264_v8 }
   0xb   :  { %261 = vset.pattern.permute.xlu0 %v266_v13 }
   0xd   :  { %234 = vmatpush3.bf16.msra.mxu0 %v233_v14 }
   0xe   :  { %235 = vmatprep.subr.bf16.mxu0 %v264_v8 }
  0x11   :  { %237 = vmatpush3.bf16.msra.mxu0 %v236_v17 }
  0x12   :  { %238 = vmatprep.subr.bf16.mxu0 %v264_v8 }
  0x15   :  { %240 = vmatpush3.bf16.msra.mxu0 %v239_v20 }
  0x16   :  { %241 = vmatprep.subr.bf16.mxu0 %v264_v8 }
  0x19   :  { %243 = vmatpush3.bf16.msra.mxu0 %v242_v24 }
  0x1a   :  { %244 = vmatprep.subr.bf16.mxu0 %v264_v8 }
  0x1d   :  { %246 = vmatpush3.bf16.msra.mxu0 %v245_v27 }
  0x1e   :  { %247 = vmatprep.subr.bf16.mxu0 %v264_v8 }
  0x21   :  { %249 = vmatpush3.bf16.msra.mxu0 %v248_v30 }
  0x81   :  { %v25_v36 = vpop.permute.xlu0 %24  ;;  %v44_v38 = vpop.permute.xlu1 %43 }
  0x82   :  { %v31_v46 = vmul.f32 %v30_v40, %v25_v36  ;;  %v50_v48 = vmul.f32 %v49_v42, %v44_v38 }
  0x86   :  { %v34_v44 = vpop.permute.xlu0 %33 }
  0x87   :  { %v54_v45 = vpop.permute.xlu1 %53  ;;  %v40_v47 = vmul.f32 %v39_v41, %v34_v44 }
  0x88   :  { %v60_v50 = vmul.f32 %v59_v43, %v54_v45 }
  0x89   :  { %v41_v49 = vadd.f32 %v40_v47, %v31_v46 }
  0x8b   :  { %v51_v51 = vadd.f32 %v50_v48, %v41_v49 }
  0x8d   :  { %v61_v53 = vadd.f32 %v60_v50, %v51_v51 }
  0x8f   :  { %v69_v54 = vadd.f32 %v172_v52, %v61_v53 }
  0x91   :  { %vm70_vm1 = vcmp.ge.f32.partialorder %v69_v54, 0.0  ;;  %v71_v55 = vmul.f32 0.01, %v69_v54 }
  0x93   :  { %v72_v56 = vsel %vm70_vm1, %v69_v54, %v71_v55 }
  0x94   :  { %224 = vmatmul.mubr.f32.vlgmr.msra.gmra.mrb[0].mxu0 %v72_v56 }
 0x167   :  { %v162_v58 = vpop.f32.mrb[0].mxu0 }
 0x168   :  { %v163_v59 = vadd.f32 %v173_v57, %v162_v58  ;;  %v225_v60 = vpop.f32.mrb[1].mxu0 }
 0x16a   :  { %167 = vst.msk [vmem:[%s367_s5] sm:$0xff] %vm166_vm2, %v163_v59 }

</bundles_post_ra>
